<compile_context>
chip_gen: v7x
topology: tpu7x:2x2x1
jax: 0.10.0
libtpu: 0.0.40
codegen_flags: <defaults>
</compile_context>

<pallas_src>
import functools

import numpy as np
import jax
import jax.numpy as jnp
from jax import lax
from jax.experimental import pallas as pl
from jax.experimental.pallas import tpu as pltpu


# ---------------------------------------------------------------------------
# Fully fused forward kernel: conv1+pool -> conv2+pool -> fc1 -> fc2
# ---------------------------------------------------------------------------
def fused_forward_kernel(x_ref, w1r_ref, w2r_ref, fw1_ref, fw2_ref, o_ref, *,
                         K1, C1, Wo1, Hp1, K2, C2, Wo2, Ho2, Hp2, Wp2):
    B = x_ref.shape[0]
    f32 = jnp.float32
    L1 = Wo1 * C1            # stage-1 conv output lanes per parity: (wo, co)
    L1P = (Wo1 - 1) * C1     # lane width after the 1x2 column pool (junk lanes kept)

    def cat(parts, axis):
        return parts[0] if len(parts) == 1 else jnp.concatenate(parts, axis=axis)

    # ---------------- stage 1: conv1 + ReLU + 2x2 maxpool -------------------
    # x_ref is (B, 2, H//2, W*Cin): input rows pre-split by parity on the host,
    # so every patch piece below is a plain contiguous static slice.
    bpatches = []
    for b in range(B):
        pieces = [x_ref[b, kh % 2, kh // 2: kh // 2 + Hp1, :]      # (Hp1, W*Cin)
                  for kh in range(K1 + 1)]
        bpatches.append(cat(pieces, 1))                            # (Hp1, (K1+1)*W*Cin)
    patch1 = cat(bpatches, 0)                                      # (B*Hp1, .)
    patch1 = cat([patch1, jnp.ones((B * Hp1, 1), f32)], 1)         # ones col -> conv1 bias
    y1 = jnp.maximum(
        jnp.dot(patch1, w1r_ref[...], preferred_element_type=f32), 0.0)  # (B*Hp1, 2*L1)
    p1 = jnp.maximum(y1[:, :L1], y1[:, L1:])      # 2x1 row pool (parity lane halves)
    p1 = jnp.maximum(p1[:, :L1P], p1[:, C1:])     # 1x2 col pool (shifted-pair max)

    # ---------------- stage 2: conv2 + ReLU + 2x2 maxpool -------------------
    bpatches = []
    for b in range(B):
        pieces = [p1[b * Hp1 + kh: b * Hp1 + kh + Ho2, :]          # (Ho2, L1P)
                  for kh in range(K2)]
        bpatches.append(cat(pieces, 1))                            # (Ho2, K2*L1P)
    patch2 = cat(bpatches, 0)                                      # (B*Ho2, .)
    patch2 = cat([patch2, jnp.ones((B * Ho2, 1), f32)], 1)         # ones col -> conv2 bias
    y2 = jnp.maximum(
        jnp.dot(patch2, w2r_ref[...], preferred_element_type=f32), 0.0)  # (B*Ho2, Wo2*C2)

    # 2x1 row pool (explicit tiny row gathers: B*Hp2 rows total)
    top = [y2[b * Ho2 + 2 * hp: b * Ho2 + 2 * hp + 1, :]
           for b in range(B) for hp in range(Hp2)]
    bot = [y2[b * Ho2 + 2 * hp + 1: b * Ho2 + 2 * hp + 2, :]
           for b in range(B) for hp in range(Hp2)]
    rp = jnp.maximum(cat(top, 0), cat(bot, 0))                     # (B*Hp2, Wo2*C2)
    # 1x2 col pool -> compact (wp2, c2) lanes
    cols = [jnp.maximum(rp[:, 2 * w * C2:(2 * w + 1) * C2],
                        rp[:, (2 * w + 1) * C2:(2 * w + 2) * C2])
            for w in range(Wp2)]
    fcin = cat(cols, 1)                                            # (B*Hp2, Wp2*C2)

    # flatten (hp2, wp2, c2) per image (fc1 rows were pre-permuted to this order)
    if Hp2 == 1:
        feat = fcin                                                # rows already = batch
    else:
        rows = []
        for b in range(B):
            rows.append(cat([fcin[b * Hp2 + hp: b * Hp2 + hp + 1, :]
                             for hp in range(Hp2)], 1))
        feat = cat(rows, 0)                                        # (B, Hp2*Wp2*C2)
    feat = cat([feat, jnp.ones((B, 1), f32)], 1)                   # ones col -> fc biases

    # ---------------- fc1 -> fc2 (biases folded into augmented weights) -----
    h = jnp.dot(feat, fw1_ref[...], preferred_element_type=f32)    # (B, HID_PAD)
    o_ref[...] = jnp.dot(h, fw2_ref[...],
                         preferred_element_type=f32).astype(o_ref.dtype)


# ---------------------------------------------------------------------------
# One-time host-side packing of the torch-layout params for the kernel
# ---------------------------------------------------------------------------
def prepare_kernel_params(params, H, W):
    cw1 = np.asarray(params["cw1"]); cb1 = np.asarray(params["cb1"])   # HWIO
    cw2 = np.asarray(params["cw2"]); cb2 = np.asarray(params["cb2"])
    fw1 = np.asarray(params["fw1"]); fb1 = np.asarray(params["fb1"])
    fw2 = np.asarray(params["fw2"]); fb2 = np.asarray(params["fb2"])

    K1, _, Cin, C1 = cw1.shape
    K2, _, C1b, C2 = cw2.shape
    assert C1b == C1
    Ho1, Wo1 = H - K1 + 1, W - K1 + 1
    Hp1, Wp1 = Ho1 // 2, Wo1 // 2
    Ho2, Wo2 = Hp1 - K2 + 1, Wp1 - K2 + 1
    Hp2, Wp2 = Ho2 // 2, Wo2 // 2
    WC = W * Cin
    L1 = Wo1 * C1
    L1P = (Wo1 - 1) * C1

    # stage-1: parity-doubled row-conv matrix.  Patch row (b, hp) contains input
    # rows 2hp .. 2hp+K1 (each W*Cin wide) plus a trailing ones column; output
    # lane par*L1 + wo*C1 + co is the conv1(+bias) value at row 2hp+par.
    w1r = np.zeros(((K1 + 1) * WC + 1, 2 * L1), np.float32)
    for par in range(2):
        for kh in range(K1):
            for kw in range(K1):
                for ci in range(Cin):
                    for wo in range(Wo1):
                        row = (par + kh) * WC + (wo + kw) * Cin + ci
                        col = par * L1 + wo * C1
                        w1r[row, col:col + C1] = cw1[kh, kw, ci, :]
    w1r[(K1 + 1) * WC, :] = np.tile(cb1, 2 * Wo1)

    # stage-2: row-conv matrix over the junk-retaining pooled lanes of stage 1
    # (pooled column wp1 / channel c1 lives at lane 2*wp1*C1 + c1; junk rows = 0).
    w2r = np.zeros((K2 * L1P + 1, Wo2 * C2), np.float32)
    for kh in range(K2):
        for kw in range(K2):
            for c1 in range(C1):
                for wo in range(Wo2):
                    row = kh * L1P + 2 * (wo + kw) * C1 + c1
                    col = wo * C2
                    w2r[row, col:col + C2] = cw2[kh, kw, c1, :]
    w2r[K2 * L1P, :] = np.tile(cb2, Wo2)

    # fc weights: fold the NHWC->NCHW flatten permutation into fc1's rows, fold
    # fb1 as fc1's last row (driven by the feat ones column), and route fb2
    # through fc1's last *padding* column so no separate bias operands are needed.
    F = C2 * Hp2 * Wp2
    assert fw1.shape[0] == F
    HID = fw1.shape[1]
    HID_PAD = ((HID + 127) // 128) * 128
    assert HID_PAD > HID                 # one spare hidden column carries fb2
    O = fw2.shape[1]

    fw1_aug = np.zeros((F + 1, HID_PAD), np.float32)
    for c2 in range(C2):
        for hp in range(Hp2):
            for wp in range(Wp2):
                mine = hp * (Wp2 * C2) + wp * C2 + c2      # kernel's (h, w, c) order
                theirs = c2 * (Hp2 * Wp2) + hp * Wp2 + wp  # torch's (c, h, w) order
                fw1_aug[mine, :HID] = fw1[theirs, :]
    fw1_aug[F, :HID] = fb1
    fw1_aug[F, HID_PAD - 1] = 1.0        # h[:, HID_PAD-1] == 1 -> feeds fb2 below
    fw2_aug = np.zeros((HID_PAD, O), np.float32)
    fw2_aug[:HID, :] = fw2
    fw2_aug[HID_PAD - 1, :] = fb2

    dims = dict(K1=int(K1), C1=int(C1), Wo1=int(Wo1), Hp1=int(Hp1),
                K2=int(K2), C2=int(C2), Wo2=int(Wo2), Ho2=int(Ho2),
                Hp2=int(Hp2), Wp2=int(Wp2))
    return dict(w1r=jnp.asarray(w1r), w2r=jnp.asarray(w2r),
                fw1=jnp.asarray(fw1_aug), fw2=jnp.asarray(fw2_aug),
                out_dim=int(O), dims=dims)


# ---------------------------------------------------------------------------
# Forward pass wrapper (single pallas_call; everything else is layout plumbing)
# ---------------------------------------------------------------------------
def base_model_forward(x_nchw, kp):
    B, Cin, H, W = x_nchw.shape
    assert H % 2 == 0
    x_nhwc = jnp.transpose(x_nchw, (0, 2, 3, 1))
    x3d = x_nhwc.reshape(B, H, W * Cin)
    # split input rows by parity so the parity-doubled conv1 patch build only
    # needs contiguous static slices inside the kernel
    x_par = jnp.stack([x3d[:, 0::2, :], x3d[:, 1::2, :]], axis=1)  # (B, 2, H//2, W*Cin)

    def full_spec(shape):
        n = len(shape)
        return pl.BlockSpec(shape, lambda i, n=n: (0,) * n)

    operands = (x_par, kp["w1r"], kp["w2r"], kp["fw1"], kp["fw2"])
    out = pl.pallas_call(
        functools.partial(fused_forward_kernel, **kp["dims"]),
        out_shape=jax.ShapeDtypeStruct((B, kp["out_dim"]), jnp.float32),
        grid=(1,),
        in_specs=[full_spec(op.shape) for op in operands],
        out_specs=full_spec((B, kp["out_dim"])),
        compiler_params=pltpu.CompilerParams(
            dimension_semantics=("arbitrary",)),
    )(*operands)
    return out


# ---------------------------------------------------------------------------
# Pure-JAX reference (correctness check only; uses original param layout)
# ---------------------------------------------------------------------------
def reference_forward(x_nchw, params):
    x = jnp.transpose(x_nchw, (0, 2, 3, 1))

    def stage(x, w, b):
        y = lax.conv_general_dilated(
            x, w, window_strides=(1, 1), padding="VALID",
            dimension_numbers=("NHWC", "HWIO", "NHWC"))
        y = jnp.maximum(y + b[None, None, None, :], 0.0)
        y = lax.reduce_window(y, -jnp.inf, lax.max,
                              (1, 2, 2, 1), (1, 2, 2, 1), "VALID")
        return y

    x = stage(x, params["cw1"], params["cb1"])
    x = stage(x, params["cw2"], params["cb2"])
    B = x.shape[0]
    x = jnp.transpose(x, (0, 3, 1, 2)).reshape(B, -1)   # torch (C, H, W) flatten
    x = x @ params["fw1"] + params["fb1"]
    x = x @ params["fw2"] + params["fb2"]
    return x


if __name__ == "__main__":
    key = jax.random.PRNGKey(0)
    ks = jax.random.split(key, 8)

    B, Cin, H, W = 2, 3, 16, 16
    x = jax.random.normal(ks[0], (B, Cin, H, W), jnp.float32)

    # conv1: 3 -> 5, 3x3 ; conv2: 5 -> 7, 5x5 (weights stored HWIO)
    cw1 = jax.random.normal(ks[1], (3, 3, 3, 5), jnp.float32) * 0.1
    cb1 = jax.random.normal(ks[2], (5,), jnp.float32) * 0.1
    cw2 = jax.random.normal(ks[3], (5, 5, 5, 7), jnp.float32) * 0.1
    cb2 = jax.random.normal(ks[4], (7,), jnp.float32) * 0.1

    # spatial sizes after the two conv+pool stages
    h1, w1s = (H - 3 + 1) // 2, (W - 3 + 1) // 2
    h2, w2s = (h1 - 5 + 1) // 2, (w1s - 5 + 1) // 2
    feat = 7 * h2 * w2s          # analogue of 7 * 147 * 147 at small scale
    HID = 1000

    fw1 = jax.random.normal(ks[5], (feat, HID), jnp.float32) * 0.05
    fb1 = jax.random.normal(ks[6], (HID,), jnp.float32) * 0.05
    fw2 = jax.random.normal(ks[7], (HID, 2), jnp.float32) * 0.05
    fb2 = jnp.zeros((2,), jnp.float32)

    params = dict(cw1=cw1, cb1=cb1, cw2=cw2, cb2=cb2,
                  fw1=fw1, fb1=fb1, fw2=fw2, fb2=fb2)
    kparams = prepare_kernel_params(params, H, W)

    out = jax.block_until_ready(base_model_forward(x, kparams))
    ref = jax.block_until_ready(reference_forward(x, params))
    np.testing.assert_allclose(np.asarray(out), np.asarray(ref),
                               rtol=1e-4, atol=1e-4)

    print("KERNEL_OK")
</pallas_src>

<mosaic_0001>
module attributes {stable_mosaic.version = 11 : i64} {
  func.func @fused_forward_kernel(%arg0: i32, %arg1: memref<2x2x8x48xf32, #tpu.memory_space<vmem>>, %arg2: memref<193x140xf32, #tpu.memory_space<vmem>>, %arg3: memref<326x21xf32, #tpu.memory_space<vmem>>, %arg4: memref<8x1024xf32, #tpu.memory_space<vmem>>, %arg5: memref<1024x2xf32, #tpu.memory_space<vmem>>, %arg6: memref<2x2xf32, #tpu.memory_space<vmem>>) attributes {dimension_semantics = [#tpu.dimension_semantics<arbitrary>], iteration_bounds = array<i64: 1>, scalar_prefetch = 0 : i64, scratch_operands = 0 : i64, tpu.core_type = #tpu.core_type<tc>, window_params = [{pipeline_mode = #tpu.pipeline_mode<synchronous>, transform_indices = @transform_0, window_bounds = array<i64: 2, 2, 8, 48>}, {pipeline_mode = #tpu.pipeline_mode<synchronous>, transform_indices = @transform_1, window_bounds = array<i64: 193, 140>}, {pipeline_mode = #tpu.pipeline_mode<synchronous>, transform_indices = @transform_2, window_bounds = array<i64: 326, 21>}, {pipeline_mode = #tpu.pipeline_mode<synchronous>, transform_indices = @transform_3, window_bounds = array<i64: 8, 1024>}, {pipeline_mode = #tpu.pipeline_mode<synchronous>, transform_indices = @transform_4, window_bounds = array<i64: 1024, 2>}, {pipeline_mode = #tpu.pipeline_mode<synchronous>, transform_indices = @transform_5, window_bounds = array<i64: 2, 2>}]} {
    %c0 = arith.constant 0 : index
    %c0_0 = arith.constant 0 : index
    %c0_1 = arith.constant 0 : index
    %c0_2 = arith.constant 0 : index
    %0 = vector.load %arg1[%c0, %c0_0, %c0_1, %c0_2] : memref<2x2x8x48xf32, #tpu.memory_space<vmem>>, vector<1x1x7x48xf32>
    %1 = vector.shape_cast %0 : vector<1x1x7x48xf32> to vector<7x48xf32>
    %c0_3 = arith.constant 0 : index
    %c1 = arith.constant 1 : index
    %c0_4 = arith.constant 0 : index
    %c0_5 = arith.constant 0 : index
    %2 = vector.load %arg1[%c0_3, %c1, %c0_4, %c0_5] : memref<2x2x8x48xf32, #tpu.memory_space<vmem>>, vector<1x1x7x48xf32>
    %3 = vector.shape_cast %2 : vector<1x1x7x48xf32> to vector<7x48xf32>
    %c0_6 = arith.constant 0 : index
    %c0_7 = arith.constant 0 : index
    %c1_8 = arith.constant 1 : index
    %c0_9 = arith.constant 0 : index
    %4 = vector.load %arg1[%c0_6, %c0_7, %c1_8, %c0_9] : memref<2x2x8x48xf32, #tpu.memory_space<vmem>>, vector<1x1x7x48xf32>
    %5 = vector.shape_cast %4 : vector<1x1x7x48xf32> to vector<7x48xf32>
    %c0_10 = arith.constant 0 : index
    %c1_11 = arith.constant 1 : index
    %c1_12 = arith.constant 1 : index
    %c0_13 = arith.constant 0 : index
    %6 = vector.load %arg1[%c0_10, %c1_11, %c1_12, %c0_13] : memref<2x2x8x48xf32, #tpu.memory_space<vmem>>, vector<1x1x7x48xf32>
    %7 = vector.shape_cast %6 : vector<1x1x7x48xf32> to vector<7x48xf32>
    %8 = tpu.concatenate %1, %3, %5, %7 in 1 : vector<7x48xf32>, vector<7x48xf32>, vector<7x48xf32>, vector<7x48xf32> -> vector<7x192xf32>
    %c1_14 = arith.constant 1 : index
    %c0_15 = arith.constant 0 : index
    %c0_16 = arith.constant 0 : index
    %c0_17 = arith.constant 0 : index
    %9 = vector.load %arg1[%c1_14, %c0_15, %c0_16, %c0_17] : memref<2x2x8x48xf32, #tpu.memory_space<vmem>>, vector<1x1x7x48xf32>
    %10 = vector.shape_cast %9 : vector<1x1x7x48xf32> to vector<7x48xf32>
    %c1_18 = arith.constant 1 : index
    %c1_19 = arith.constant 1 : index
    %c0_20 = arith.constant 0 : index
    %c0_21 = arith.constant 0 : index
    %11 = vector.load %arg1[%c1_18, %c1_19, %c0_20, %c0_21] : memref<2x2x8x48xf32, #tpu.memory_space<vmem>>, vector<1x1x7x48xf32>
    %12 = vector.shape_cast %11 : vector<1x1x7x48xf32> to vector<7x48xf32>
    %c1_22 = arith.constant 1 : index
    %c0_23 = arith.constant 0 : index
    %c1_24 = arith.constant 1 : index
    %c0_25 = arith.constant 0 : index
    %13 = vector.load %arg1[%c1_22, %c0_23, %c1_24, %c0_25] : memref<2x2x8x48xf32, #tpu.memory_space<vmem>>, vector<1x1x7x48xf32>
    %14 = vector.shape_cast %13 : vector<1x1x7x48xf32> to vector<7x48xf32>
    %c1_26 = arith.constant 1 : index
    %c1_27 = arith.constant 1 : index
    %c1_28 = arith.constant 1 : index
    %c0_29 = arith.constant 0 : index
    %15 = vector.load %arg1[%c1_26, %c1_27, %c1_28, %c0_29] : memref<2x2x8x48xf32, #tpu.memory_space<vmem>>, vector<1x1x7x48xf32>
    %16 = vector.shape_cast %15 : vector<1x1x7x48xf32> to vector<7x48xf32>
    %17 = tpu.concatenate %10, %12, %14, %16 in 1 : vector<7x48xf32>, vector<7x48xf32>, vector<7x48xf32>, vector<7x48xf32> -> vector<7x192xf32>
    %18 = tpu.concatenate %8, %17 in 0 : vector<7x192xf32>, vector<7x192xf32> -> vector<14x192xf32>
    %cst = arith.constant 1.000000e+00 : f32
    %19 = vector.broadcast %cst : f32 to vector<14x1xf32>
    %20 = tpu.concatenate %18, %19 in 1 : vector<14x192xf32>, vector<14x1xf32> -> vector<14x193xf32>
    %c0_30 = arith.constant 0 : index
    %c0_31 = arith.constant 0 : index
    %21 = vector.load %arg2[%c0_30, %c0_31] : memref<193x140xf32, #tpu.memory_space<vmem>>, vector<193x140xf32>
    %cst_32 = arith.constant dense<0.000000e+00> : vector<14x140xf32>
    %22 = tpu.matmul %20, %21, %cst_32 {dimension_numbers = #tpu.dot_dimension_numbers<[1], [0], [0], [1], [0, 0, 1, 1], [], []>} : vector<14x193xf32>, vector<193x140xf32>, vector<14x140xf32> -> vector<14x140xf32>
    %cst_33 = arith.constant 0.000000e+00 : f32
    %23 = vector.broadcast %cst_33 : f32 to vector<14x140xf32>
    %24 = arith.maximumf %22, %23 : vector<14x140xf32>
    %25 = vector.extract_strided_slice %24 {offsets = [0, 0], sizes = [14, 70], strides = [1, 1]} : vector<14x140xf32> to vector<14x70xf32>
    %26 = vector.extract_strided_slice %24 {offsets = [0, 70], sizes = [14, 70], strides = [1, 1]} : vector<14x140xf32> to vector<14x70xf32>
    %27 = arith.maximumf %25, %26 : vector<14x70xf32>
    %28 = vector.extract_strided_slice %27 {offsets = [0, 0], sizes = [14, 65], strides = [1, 1]} : vector<14x70xf32> to vector<14x65xf32>
    %29 = vector.extract_strided_slice %27 {offsets = [0, 5], sizes = [14, 65], strides = [1, 1]} : vector<14x70xf32> to vector<14x65xf32>
    %30 = arith.maximumf %28, %29 : vector<14x65xf32>
    %31 = vector.extract_strided_slice %30 {offsets = [0, 0], sizes = [3, 65], strides = [1, 1]} : vector<14x65xf32> to vector<3x65xf32>
    %32 = vector.extract_strided_slice %30 {offsets = [1, 0], sizes = [3, 65], strides = [1, 1]} : vector<14x65xf32> to vector<3x65xf32>
    %33 = vector.extract_strided_slice %30 {offsets = [2, 0], sizes = [3, 65], strides = [1, 1]} : vector<14x65xf32> to vector<3x65xf32>
    %34 = vector.extract_strided_slice %30 {offsets = [3, 0], sizes = [3, 65], strides = [1, 1]} : vector<14x65xf32> to vector<3x65xf32>
    %35 = vector.extract_strided_slice %30 {offsets = [4, 0], sizes = [3, 65], strides = [1, 1]} : vector<14x65xf32> to vector<3x65xf32>
    %36 = tpu.concatenate %31, %32, %33, %34, %35 in 1 : vector<3x65xf32>, vector<3x65xf32>, vector<3x65xf32>, vector<3x65xf32>, vector<3x65xf32> -> vector<3x325xf32>
    %37 = vector.extract_strided_slice %30 {offsets = [7, 0], sizes = [3, 65], strides = [1, 1]} : vector<14x65xf32> to vector<3x65xf32>
    %38 = vector.extract_strided_slice %30 {offsets = [8, 0], sizes = [3, 65], strides = [1, 1]} : vector<14x65xf32> to vector<3x65xf32>
    %39 = vector.extract_strided_slice %30 {offsets = [9, 0], sizes = [3, 65], strides = [1, 1]} : vector<14x65xf32> to vector<3x65xf32>
    %40 = vector.extract_strided_slice %30 {offsets = [10, 0], sizes = [3, 65], strides = [1, 1]} : vector<14x65xf32> to vector<3x65xf32>
    %41 = vector.extract_strided_slice %30 {offsets = [11, 0], sizes = [3, 65], strides = [1, 1]} : vector<14x65xf32> to vector<3x65xf32>
    %42 = tpu.concatenate %37, %38, %39, %40, %41 in 1 : vector<3x65xf32>, vector<3x65xf32>, vector<3x65xf32>, vector<3x65xf32>, vector<3x65xf32> -> vector<3x325xf32>
    %43 = tpu.concatenate %36, %42 in 0 : vector<3x325xf32>, vector<3x325xf32> -> vector<6x325xf32>
    %cst_34 = arith.constant 1.000000e+00 : f32
    %44 = vector.broadcast %cst_34 : f32 to vector<6x1xf32>
    %45 = tpu.concatenate %43, %44 in 1 : vector<6x325xf32>, vector<6x1xf32> -> vector<6x326xf32>
    %c0_35 = arith.constant 0 : index
    %c0_36 = arith.constant 0 : index
    %46 = vector.load %arg3[%c0_35, %c0_36] : memref<326x21xf32, #tpu.memory_space<vmem>>, vector<326x21xf32>
    %cst_37 = arith.constant dense<0.000000e+00> : vector<6x21xf32>
    %47 = tpu.matmul %45, %46, %cst_37 {dimension_numbers = #tpu.dot_dimension_numbers<[1], [0], [0], [1], [0, 0, 1, 1], [], []>} : vector<6x326xf32>, vector<326x21xf32>, vector<6x21xf32> -> vector<6x21xf32>
    %cst_38 = arith.constant 0.000000e+00 : f32
    %48 = vector.broadcast %cst_38 : f32 to vector<6x21xf32>
    %49 = arith.maximumf %47, %48 : vector<6x21xf32>
    %50 = vector.extract_strided_slice %49 {offsets = [0, 0], sizes = [1, 21], strides = [1, 1]} : vector<6x21xf32> to vector<1x21xf32>
    %51 = vector.extract_strided_slice %49 {offsets = [3, 0], sizes = [1, 21], strides = [1, 1]} : vector<6x21xf32> to vector<1x21xf32>
    %52 = vector.extract_strided_slice %49 {offsets = [1, 0], sizes = [1, 21], strides = [1, 1]} : vector<6x21xf32> to vector<1x21xf32>
    %53 = vector.extract_strided_slice %49 {offsets = [4, 0], sizes = [1, 21], strides = [1, 1]} : vector<6x21xf32> to vector<1x21xf32>
    %54 = tpu.concatenate %50, %51 in 0 : vector<1x21xf32>, vector<1x21xf32> -> vector<2x21xf32>
    %55 = tpu.concatenate %52, %53 in 0 : vector<1x21xf32>, vector<1x21xf32> -> vector<2x21xf32>
    %56 = arith.maximumf %54, %55 : vector<2x21xf32>
    %57 = vector.extract_strided_slice %56 {offsets = [0, 0], sizes = [2, 7], strides = [1, 1]} : vector<2x21xf32> to vector<2x7xf32>
    %58 = vector.extract_strided_slice %56 {offsets = [0, 7], sizes = [2, 7], strides = [1, 1]} : vector<2x21xf32> to vector<2x7xf32>
    %59 = arith.maximumf %57, %58 : vector<2x7xf32>
    %cst_39 = arith.constant 1.000000e+00 : f32
    %60 = vector.broadcast %cst_39 : f32 to vector<2x1xf32>
    %61 = tpu.concatenate %59, %60 in 1 : vector<2x7xf32>, vector<2x1xf32> -> vector<2x8xf32>
    %c0_40 = arith.constant 0 : index
    %c0_41 = arith.constant 0 : index
    %62 = vector.load %arg4[%c0_40, %c0_41] : memref<8x1024xf32, #tpu.memory_space<vmem>>, vector<8x1024xf32>
    %cst_42 = arith.constant dense<0.000000e+00> : vector<2x1024xf32>
    %63 = tpu.matmul %61, %62, %cst_42 {dimension_numbers = #tpu.dot_dimension_numbers<[1], [0], [0], [1], [0, 0, 1, 1], [], []>} : vector<2x8xf32>, vector<8x1024xf32>, vector<2x1024xf32> -> vector<2x1024xf32>
    %c0_43 = arith.constant 0 : index
    %c0_44 = arith.constant 0 : index
    %64 = vector.load %arg5[%c0_43, %c0_44] : memref<1024x2xf32, #tpu.memory_space<vmem>>, vector<1024x2xf32>
    %cst_45 = arith.constant dense<0.000000e+00> : vector<2x2xf32>
    %65 = tpu.matmul %63, %64, %cst_45 {dimension_numbers = #tpu.dot_dimension_numbers<[1], [0], [0], [1], [0, 0, 1, 1], [], []>} : vector<2x1024xf32>, vector<1024x2xf32>, vector<2x2xf32> -> vector<2x2xf32>
    %c0_46 = arith.constant 0 : index
    %c0_47 = arith.constant 0 : index
    %66 = vector.load %arg6[%c0_46, %c0_47] : memref<2x2xf32, #tpu.memory_space<vmem>>, vector<2x2xf32>
    tpu.vector_store %arg6[%c0_46, %c0_47], %65 {strides = array<i32>} : memref<2x2xf32, #tpu.memory_space<vmem>>, vector<2x2xf32>,
    return
  }
  func.func @transform_0(%arg0: i32) -> (i32, i32, i32, i32) {
    %c0_i32 = arith.constant 0 : i32
    %c0_i32_0 = arith.constant 0 : i32
    %c0_i32_1 = arith.constant 0 : i32
    %c0_i32_2 = arith.constant 0 : i32
    %c0_i32_3 = arith.constant 0 : i32
    return %c0_i32, %c0_i32_0, %c0_i32_1, %c0_i32_2 : i32, i32, i32, i32
  }
  func.func @transform_1(%arg0: i32) -> (i32, i32) {
    %c0_i32 = arith.constant 0 : i32
    %c0_i32_0 = arith.constant 0 : i32
    %c0_i32_1 = arith.constant 0 : i32
    return %c0_i32, %c0_i32_0 : i32, i32
  }
  func.func @transform_2(%arg0: i32) -> (i32, i32) {
    %c0_i32 = arith.constant 0 : i32
    %c0_i32_0 = arith.constant 0 : i32
    %c0_i32_1 = arith.constant 0 : i32
    return %c0_i32, %c0_i32_0 : i32, i32
  }
  func.func @transform_3(%arg0: i32) -> (i32, i32) {
    %c0_i32 = arith.constant 0 : i32
    %c0_i32_0 = arith.constant 0 : i32
    %c0_i32_1 = arith.constant 0 : i32
    return %c0_i32, %c0_i32_0 : i32, i32
  }
  func.func @transform_4(%arg0: i32) -> (i32, i32) {
    %c0_i32 = arith.constant 0 : i32
    %c0_i32_0 = arith.constant 0 : i32
    %c0_i32_1 = arith.constant 0 : i32
    return %c0_i32, %c0_i32_0 : i32, i32
  }
  func.func @transform_5(%arg0: i32) -> (i32, i32) {
    %c0_i32 = arith.constant 0 : i32
    %c0_i32_0 = arith.constant 0 : i32
    %c0_i32_1 = arith.constant 0 : i32
    return %c0_i32, %c0_i32_0 : i32, i32
  }
}

</mosaic_0001>

<bundles_post_ra>
// kernel: tpu_custom_call.1
= control target key start
LH: loop header
LB: loop body
LE: loop exit
PB: predicated region body
PF: predicated region fallthrough
CT: control target
= control target key end

     0   :  { %s1735_s22 = smov 96   ;;  %s1736_s23 = smov 48   ;;  %s2544_s0 = inlined_call_operand.vmem [shape: f32[2,2,8,48], index: 0, kind: input, shape index: {}]   ;;  %s2545_s1 = inlined_call_operand.vmem [shape: f32[193,140], index: 1, kind: input, shape index: {}]   ;;  %s2546_s2 = inlined_call_operand.vmem [shape: f32[326,21], index: 2, kind: input, shape index: {}]   ;;  %s2547_s3 = inlined_call_operand.vmem [shape: f32[8,1024], index: 3, kind: input, shape index: {}]   ;;  %s2548_s4 = inlined_call_operand.vmem [shape: f32[1024,2], index: 4, kind: input, shape index: {}]   ;;  %s2549_s5 = inlined_call_operand.hbm [shape: f32[2,2], index: 5, kind: output, shape index: {}]  }
   0x1   :  { %v1249_v0 = vld [vmem:[%s2544_s0 + $0x11] sm:$0x7f]  ;;  %v1248_v1 = vld [vmem:[%s2544_s0 + $0x18] sm:$0x7f]  ;;  %v24_v3 = vld [vmem:[%s2544_s0 + $0x1] sm:$0x7f] }
   0x2   :  { %55 = vrot.lane.b32.xlu0 %v1249_v0, %s1735_s22  ;;  %51 = vrot.lane.b32.xlu1 %v1248_v1, %s1736_s23  ;;  %v1250_v2 = vld [vmem:[%s2544_s0 + $0x19] sm:$0x7f]  ;;  %v78_v4 = vld [vmem:[%s2545_s1 + $0x8] sm:$0xff]  ;;  %s1737_s17 = smov 16  }
   0x3   :  { %v80_v5 = vld [vmem:[%s2545_s1 + $0x18] sm:$0xff]  ;;  %v77_v6 = vld [vmem:[%s2545_s1] sm:$0xff]  ;;  %v79_v7 = vld [vmem:[%s2545_s1 + $0x10] sm:$0xff] }
   0x4   :  { %v1467_v8 = vpack.c.bf16 %v80_v5, %v78_v4  ;;  %v1469_v9 = vpack.c.bf16 %v79_v7, %v77_v6  ;;  %v82_v10 = vld [vmem:[%s2545_s1 + $0x28] sm:$0xff]  ;;  %v84_v11 = vld [vmem:[%s2545_s1 + $0x38] sm:$0xff]  ;;  %v81_v12 = vld [vmem:[%s2545_s1 + $0x20] sm:$0xff] }
   0x5   :  { %v1471_v13 = vpack.c.bf16 %v84_v11, %v82_v10  ;;  %v83_v14 = vld [vmem:[%s2545_s1 + $0x30] sm:$0xff]  ;;  %v86_v15 = vld [vmem:[%s2545_s1 + $0x48] sm:$0xff]  ;;  %v88_v18 = vld [vmem:[%s2545_s1 + $0x58] sm:$0xff] }
   0x6   :  { %59 = vrot.lane.b32.xlu0 %v1250_v2, %s1737_s17  ;;  %31 = vrot.lane.b32.xlu1 %v24_v3, %s1735_s22  ;;  %v1246_v16 = vld [vmem:[%s2544_s0 + $0x9] sm:$0x7f]  ;;  %v1473_v19 = vpack.c.bf16 %v83_v14, %v81_v12  ;;  %v1475_v20 = vpack.c.bf16 %v88_v18, %v86_v15  ;;  %v85_v21 = vld [vmem:[%s2545_s1 + $0x40] sm:$0xff] }
   0x7   :  { %v1245_v17 = vld [vmem:[%s2544_s0 + $0x8] sm:$0x7f]  ;;  %1468 = vmatprep.subr.bf16.mxu0 %v1467_v8  ;;  %v87_v22 = vld [vmem:[%s2545_s1 + $0x50] sm:$0xff]  ;;  %v92_v24 = vld [vmem:[%s2545_s1 + $0x78] sm:$0xff] }
   0x8   :  { %1470 = vmatpush1.bf16.msra.mxu0 %v1469_v9  ;;  %v90_v23 = vld [vmem:[%s2545_s1 + $0x68] sm:$0xff]  ;;  %v1477_v25 = vpack.c.bf16 %v87_v22, %v85_v21  ;;  %v89_v27 = vld [vmem:[%s2545_s1 + $0x60] sm:$0xff]  ;;  %v91_v28 = vld [vmem:[%s2545_s1 + $0x70] sm:$0xff] }
   0x9   :  { %1472 = vmatprep.subr.bf16.mxu0 %v1471_v13  ;;  %v1479_v26 = vpack.c.bf16 %v92_v24, %v90_v23  ;;  %v94_v29 = vld [vmem:[%s2545_s1 + $0x88] sm:$0xff]  ;;  %v96_v30 = vld [vmem:[%s2545_s1 + $0x98] sm:$0xff]  ;;  %v1481_v31 = vpack.c.bf16 %v91_v28, %v89_v27  ;;  %v93_v33 = vld [vmem:[%s2545_s1 + $0x80] sm:$0xff] }
   0xa   :  { %35 = vrot.lane.b32.xlu0 %v1246_v16, %s1737_s17  ;;  %27 = vrot.lane.b32.xlu1 %v1245_v17, %s1736_s23  ;;  %v1483_v32 = vpack.c.bf16 %v96_v30, %v94_v29  ;;  %v95_v34 = vld [vmem:[%s2545_s1 + $0x90] sm:$0xff]  ;;  %v98_v35 = vld [vmem:[%s2545_s1 + $0xa8] sm:$0xff] }
   0xb   :  { %v100_v36 = vld [vmem:[%s2545_s1 + $0xb8] sm:$0xff]  ;;  %v1485_v37 = vpack.c.bf16 %v95_v34, %v93_v33  ;;  %v97_v39 = vld [vmem:[%s2545_s1 + $0xa0] sm:$0xff]  ;;  %v99_v40 = vld [vmem:[%s2545_s1 + $0xb0] sm:$0xff] }
   0xc   :  { %1474 = vmatpush1.bf16.msra.mxu0 %v1473_v19  ;;  %v1487_v38 = vpack.c.bf16 %v100_v36, %v98_v35 }
   0xd   :  { %1476 = vmatprep.subr.bf16.mxu0 %v1475_v20 }
  0x10   :  { %1478 = vmatpush1.bf16.msra.mxu0 %v1477_v25 }
  0x11   :  { %1480 = vmatprep.subr.bf16.mxu0 %v1479_v26 }
  0x14   :  { %1482 = vmatpush1.bf16.msra.mxu0 %v1481_v31 }
  0x15   :  { %1484 = vmatprep.subr.bf16.mxu0 %v1483_v32 }
  0x16   :  { %10 = vsyncpa [#allocation3], 0  ;;  %v102_v41 = vld [vmem:[%s2545_s1 + $0xc8] sm:$0xff]  ;;  %v104_v42 = vld [vmem:[%s2545_s1 + $0xd8] sm:$0xff]  ;;  %v1489_v43 = vpack.c.bf16 %v99_v40, %v97_v39  ;;  %vm134_vm0 = vcmask 1040384   ;;  %vm38_vm1 = vcmask 392192  }
  0x17   :  { %v1491_v44 = vpack.c.bf16 %v104_v42, %v102_v41  ;;  %v101_v45 = vld [vmem:[%s2545_s1 + $0xc0] sm:$0xff]  ;;  %v103_v46 = vld [vmem:[%s2545_s1 + $0xd0] sm:$0xff]  ;;  %v106_v47 = vld [vmem:[%s2545_s1 + $0xe8] sm:$0xff]  ;;  %vm42_vm2 = vcmask 130048   ;;  %vm40_vm3 = vcmask 785408   ;;  %vm71_vm4 = vcmask 1046528  }
  0x18   :  { %1486 = vmatpush1.bf16.msra.mxu0 %v1485_v37  ;;  %v108_v48 = vld [vmem:[%s2545_s1 + $0xf8] sm:$0xff]  ;;  %v1493_v49 = vpack.c.bf16 %v103_v46, %v101_v45  ;;  %v105_v51 = vld [vmem:[%s2545_s1 + $0xe0] sm:$0xff]  ;;  %v107_v52 = vld [vmem:[%s2545_s1 + $0xf0] sm:$0xff]  ;;  %vm127_vm5 = vcmask 531456   ;;  %vm74_vm6 = vcmask 523264   ;;  %vm234_vm7 = vcmask 474112  }
  0x19   :  { %1488 = vmatprep.subr.bf16.mxu0 %v1487_v38  ;;  %v1495_v50 = vpack.c.bf16 %v108_v48, %v106_v47  ;;  %v110_v53 = vld [vmem:[%s2545_s1 + $0x108] sm:$0xff]  ;;  %v112_v54 = vld [vmem:[%s2545_s1 + $0x118] sm:$0xff]  ;;  %v1497_v55 = vpack.c.bf16 %v107_v52, %v105_v51  ;;  %v109_v57 = vld [vmem:[%s2545_s1 + $0x100] sm:$0xff]  ;;  %s1739_s12 = smov 123   ;;  %s1741_s24 = smov 2   ;;  %vm269_vm8 = vcmask 15360  }
  0x1a   :  { %v1499_v56 = vpack.c.bf16 %v112_v54, %v110_v53  ;;  %v111_v58 = vld [vmem:[%s2545_s1 + $0x110] sm:$0xff]  ;;  %v114_v59 = vld [vmem:[%s2545_s1 + $0x128] sm:$0xff]  ;;  %v116_v60 = vld [vmem:[%s2545_s1 + $0x138] sm:$0xff]  ;;  %s1742_s25 = smov 65   ;;  %s1743_s26 = smov 67   ;;  %vm271_vm9 = vcmask 547840  }
  0x1b   :  { %v1501_v61 = vpack.c.bf16 %v111_v58, %v109_v57  ;;  %v1503_v62 = vpack.c.bf16 %v116_v60, %v114_v59  ;;  %v113_v63 = vld [vmem:[%s2545_s1 + $0x120] sm:$0xff]  ;;  %v115_v0 = vld [vmem:[%s2545_s1 + $0x130] sm:$0xff]  ;;  %v118_v1 = vld [vmem:[%s2545_s1 + $0x148] sm:$0xff]  ;;  %s1744_s27 = smov 4   ;;  %vm301_vm10 = vcmask 1043456   ;;  %vm312_vm11 = vcmask 1042432  }
  0x1c   :  { %1490 = vmatpush1.bf16.msra.mxu0 %v1489_v43  ;;  %v120_v2 = vld [vmem:[%s2545_s1 + $0x158] sm:$0xff]  ;;  %v1505_v3 = vpack.c.bf16 %v115_v0, %v113_v63  ;;  %v117_v5 = vld [vmem:[%s2545_s1 + $0x140] sm:$0xff]  ;;  %v119_v6 = vld [vmem:[%s2545_s1 + $0x150] sm:$0xff]  ;;  %vm1746_vm12 = vmmov 0   ;;  %vm273_vm13 = vcmask 31744   ;;  %vm316_vm14 = vcmask 564224  }
  0x1d   :  { %1492 = vmatprep.subr.bf16.mxu0 %v1491_v44  ;;  %v1507_v4 = vpack.c.bf16 %v120_v2, %v118_v1  ;;  %v122_v7 = vld [vmem:[%s2545_s1 + $0x168] sm:$0xff]  ;;  %v124_v8 = vld [vmem:[%s2545_s1 + $0x178] sm:$0xff]  ;;  %v1509_v9 = vpack.c.bf16 %v119_v6, %v117_v5  ;;  %v121_v11 = vld [vmem:[%s2545_s1 + $0x160] sm:$0xff]  ;;  %vm363_vm15 = vcmask 1045504   ;;  %s1747_s29 = smov 121  }
  0x1e   :  { %v1511_v10 = vpack.c.bf16 %v124_v8, %v122_v7  ;;  %v123_v12 = vld [vmem:[%s2545_s1 + $0x170] sm:$0xff]  ;;  %v126_v14 = vld [vmem:[%s2545_s1 + $0x188] sm:$0x1]  ;;  %v125_v15 = vld [vmem:[%s2545_s1 + $0x180] sm:$0x1] }
  0x1f   :  { %v1513_v13 = vpack.c.bf16 %v123_v12, %v121_v11  ;;  %v1247_v17 = vld [vmem:[%s2544_s0 + $0x10] sm:$0x7f]  ;;  %v21_v24 = vld [vmem:[%s2544_s0] sm:$0x7f]  ;;  %s1738_s0 = smov 58   ;;  %v335_v53 = vld [vmem:[%s2546_s2 + $0x88] sm:$0xff] }
  0x20   :  { %1494 = vmatpush1.bf16.msra.mxu0 %v1493_v49  ;;  %v334_v52 = vld [vmem:[%s2546_s2 + $0x80] sm:$0xff]  ;;  %v336_v57 = vld [vmem:[%s2546_s2 + $0x90] sm:$0xff]  ;;  %v337_v58 = vld [vmem:[%s2546_s2 + $0x98] sm:$0xff] }
  0x21   :  { %1496 = vmatprep.subr.bf16.mxu0 %v1495_v50  ;;  %v318_v54 = vld [vmem:[%s2546_s2] sm:$0xff]  ;;  %v1519_v60 = vpack.c.bf16 %v337_v58, %v336_v57  ;;  %v339_v0 = vld [vmem:[%s2546_s2 + $0xa8] sm:$0xff]  ;;  %v340_v5 = vld [vmem:[%s2546_s2 + $0xb0] sm:$0xff] }
  0x22   :  { %v338_v63 = vld [vmem:[%s2546_s2 + $0xa0] sm:$0xff]  ;;  %v341_v6 = vld [vmem:[%s2546_s2 + $0xb8] sm:$0xff]  ;;  %v343_v12 = vld [vmem:[%s2546_s2 + $0xc8] sm:$0xff] }
  0x23   :  { %v1523_v2 = vpack.c.bf16 %v339_v0, %v338_v63  ;;  %v1527_v8 = vpack.c.bf16 %v341_v6, %v340_v5  ;;  %v342_v11 = vld [vmem:[%s2546_s2 + $0xc0] sm:$0xff] }
  0x24   :  { %1498 = vmatpush1.bf16.msra.mxu0 %v1497_v55  ;;  %v1515_v55 = vpack.c.bf16 %v335_v53, %v334_v52 }
  0x25   :  { %1500 = vmatprep.subr.bf16.mxu0 %v1499_v56  ;;  %v319_v56 = vld [vmem:[%s2546_s2 + $0x8] sm:$0xff] }
  0x26   :  { %v1517_v59 = vpack.c.bf16 %v319_v56, %v318_v54  ;;  %1516 = vmatprep.subr.bf16.mxu1 %v1515_v55 }
  0x28   :  { %1502 = vmatpush1.bf16.msra.mxu0 %v1501_v61  ;;  %v320_v61 = vld [vmem:[%s2546_s2 + $0x10] sm:$0xff]  ;;  %1518 = vmatpush3.bf16.msra.mxu1 %v1517_v59 }
  0x29   :  { %1504 = vmatprep.subr.bf16.mxu0 %v1503_v62  ;;  %v321_v62 = vld [vmem:[%s2546_s2 + $0x18] sm:$0xff]  ;;  %1520 = vmatprep.subr.bf16.mxu1 %v1519_v60 }
  0x2a   :  { %v1521_v1 = vpack.c.bf16 %v321_v62, %v320_v61 }
  0x2c   :  { %1506 = vmatpush1.bf16.msra.mxu0 %v1505_v3  ;;  %v322_v3 = vld [vmem:[%s2546_s2 + $0x20] sm:$0xff]  ;;  %1522 = vmatpush3.bf16.msra.mxu1 %v1521_v1 }
  0x2d   :  { %1508 = vmatprep.subr.bf16.mxu0 %v1507_v4  ;;  %v323_v4 = vld [vmem:[%s2546_s2 + $0x28] sm:$0xff]  ;;  %1524 = vmatprep.subr.bf16.mxu1 %v1523_v2  ;;  %v350_v2 = vld [vmem:[%s2546_s2 + $0x100] sm:$0xff] }
  0x2e   :  { %v1525_v7 = vpack.c.bf16 %v323_v4, %v322_v3  ;;  %v351_v3 = vld [vmem:[%s2546_s2 + $0x108] sm:$0xff] }
  0x30   :  { %1510 = vmatpush1.bf16.msra.mxu0 %v1509_v9  ;;  %v324_v9 = vld [vmem:[%s2546_s2 + $0x30] sm:$0xff]  ;;  %1526 = vmatpush3.bf16.msra.mxu1 %v1525_v7 }
  0x31   :  { %1512 = vmatprep.subr.bf16.mxu0 %v1511_v10  ;;  %v325_v10 = vld [vmem:[%s2546_s2 + $0x38] sm:$0xff]  ;;  %1528 = vmatprep.subr.bf16.mxu1 %v1527_v8  ;;  %v1548_v8 = vpack.c.bf16 %v351_v3, %v350_v2  ;;  %v871_v2 = vld [vmem:[%s2548_s4 + $0x190] sm:$0xff] }
  0x32   :  { %v872_v3 = vld [vmem:[%s2548_s4 + $0x198] sm:$0xff] }
  0x34   :  { %1514 = vmatpush1.bf16.msra.mxu0 %v1513_v13  ;;  %v1529_v13 = vpack.c.bf16 %v325_v10, %v324_v9 }
  0x35   :  { %1251 = vmatprep.subr.msk.mxu0 %vm134_vm0, %v126_v14  ;;  %v1531_v14 = vpack.c.bf16 %v343_v12, %v342_v11  ;;  %v352_v11 = vld [vmem:[%s2546_s2 + $0x110] sm:$0xff]  ;;  %v353_v12 = vld [vmem:[%s2546_s2 + $0x118] sm:$0xff] }
  0x36   :  { %1530 = vmatpush3.bf16.msra.mxu1 %v1529_v13 }
  0x37   :  { %1532 = vmatprep.subr.bf16.mxu1 %v1531_v14  ;;  %v1551_v14 = vpack.c.bf16 %v353_v12, %v352_v11  ;;  %v856_v11 = vld [vmem:[%s2548_s4 + $0x118] sm:$0xff]  ;;  %v841_v12 = vld [vmem:[%s2548_s4 + $0xa0] sm:$0xff] }
  0x38   :  { %1252 = vmatpush1.msk.msra.mxu0 %vm134_vm0, %v125_v15  ;;  %v326_v15 = vld [vmem:[%s2546_s2 + $0x40] sm:$0xff] }
  0x74   :  { %v56_v16 = vpop.permute.xlu0 %55  ;;  %v52_v18 = vpop.permute.xlu1 %51 }
  0x75   :  { %v62_v19 = vsel %vm38_vm1, %v1247_v17, %v52_v18  ;;  %v344_v17 = vld [vmem:[%s2546_s2 + $0xd0] sm:$0xff]  ;;  %v345_v18 = vld [vmem:[%s2546_s2 + $0xd8] sm:$0xff] }
  0x76   :  { %v63_v23 = vsel %vm40_vm3, %v62_v19, %v56_v16 }
  0x77   :  { %v67_v28 = vrot.slane %v63_v23, 1 }
  0x78   :  { %v60_v20 = vpop.permute.xlu0 %59  ;;  %v32_v21 = vpop.permute.xlu1 %31 }
  0x79   :  { %v64_v22 = vsel %vm42_vm2, %v56_v16, %v60_v20  ;;  %v327_v16 = vld [vmem:[%s2546_s2 + $0x48] sm:$0xff]  ;;  %v1535_v20 = vpack.c.bf16 %v345_v18, %v344_v17 }
  0x7a   :  { %v68_v25 = vrot.slane %v64_v22, 1  ;;  %v1533_v19 = vpack.c.bf16 %v327_v16, %v326_v15  ;;  %v329_v22 = vld [vmem:[%s2546_s2 + $0x58] sm:$0xff]  ;;  %v354_v15 = vld [vmem:[%s2546_s2 + $0x120] sm:$0xff]  ;;  %v355_v16 = vld [vmem:[%s2546_s2 + $0x128] sm:$0xff] }
  0x7b   :  { %v1554_v18 = vpack.c.bf16 %v355_v16, %v354_v15 }
  0x7c   :  { %v36_v26 = vpop.permute.xlu0 %35  ;;  %v28_v27 = vpop.permute.xlu1 %27  ;;  %v76_v35 = vsel %vm74_vm6, %v68_v25, 1.0  ;;  %1534 = vmatpush3.bf16.msra.mxu1 %v1533_v19  ;;  %v356_v19 = vld [vmem:[%s2546_s2 + $0x130] sm:$0xff] }
  0x7d   :  { %v43_v29 = vsel %vm42_vm2, %v32_v21, %v36_v26  ;;  %v39_v30 = vsel %vm38_vm1, %v21_v24, %v28_v27  ;;  %1536 = vmatprep.subr.bf16.mxu1 %v1535_v20  ;;  %v346_v24 = vld [vmem:[%s2546_s2 + $0xe0] sm:$0xff]  ;;  %v357_v20 = vld [vmem:[%s2546_s2 + $0x138] sm:$0xff]  ;;  %vm359_vm1 = vcmask 572416   ;;  %vm523_vm2 = vcmask 56320  }
  0x7e   :  { %v73_v31 = vsel %vm71_vm4, %v43_v29, %v68_v25  ;;  %v41_v32 = vsel %vm40_vm3, %v39_v30, %v32_v21  ;;  %v328_v21 = vld [vmem:[%s2546_s2 + $0x50] sm:$0xff]  ;;  %v347_v25 = vld [vmem:[%s2546_s2 + $0xe8] sm:$0xff]  ;;  %v330_v27 = vld [vmem:[%s2546_s2 + $0x60] sm:$0xff]  ;;  %vm1229_vm3 = vcmask 9216  }
  0x7f   :  { %v75_v33 = vsel %vm74_vm6, %v73_v31, 1.0  ;;  %v72_v34 = vsel %vm71_vm4, %v41_v32, %v67_v28  ;;  %v1537_v23 = vpack.c.bf16 %v329_v22, %v328_v21  ;;  %v1539_v26 = vpack.c.bf16 %v347_v25, %v346_v24  ;;  %v348_v30 = vld [vmem:[%s2546_s2 + $0xf0] sm:$0xff]  ;;  %v349_v31 = vld [vmem:[%s2546_s2 + $0xf8] sm:$0xff] }
  0x80   :  { %1253 = vmatprep.mubr.msk.f32.mxu0 %vm127_vm5, %v75_v33  ;;  %v1543_v33 = vpack.c.bf16 %v349_v31, %v348_v30  ;;  %v1557_v22 = vpack.c.bf16 %v357_v20, %v356_v19  ;;  %v527_v30 = vld [vmem:[%s2547_s3 + $0x10] sm:$0xff]  ;;  %v526_v31 = vld [vmem:[%s2547_s3 + $0x8] sm:$0xff] }
  0x81   :  { %206 = vmatmul.mubr.f32.vlgmr.msra.gmra.mrb[0].mxu0 %v72_v34  ;;  %1538 = vmatpush3.bf16.msra.mxu1 %v1537_v23  ;;  %v332_v34 = vld [vmem:[%s2546_s2 + $0x70] sm:$0xff] }
  0x82   :  { %1254 = vmatprep.mubr.msk.f32.mxu0 %vm127_vm5, %v76_v35  ;;  %1540 = vmatprep.subr.bf16.mxu1 %v1539_v26  ;;  %v333_v35 = vld [vmem:[%s2546_s2 + $0x78] sm:$0xff] }
  0x85   :  { %212 = vmatmul.mubr.f32.gmra.mrb[2].mxu0 %v67_v28  ;;  %v331_v28 = vld [vmem:[%s2546_s2 + $0x68] sm:$0xff] }
  0x86   :  { %v1541_v29 = vpack.c.bf16 %v331_v28, %v330_v27  ;;  %v358_v27 = vld [vmem:[%s2546_s2 + $0x140] sm:$0x3f] }
  0x88   :  { %1542 = vmatpush3.bf16.msra.mxu1 %v1541_v29  ;;  %v528_v29 = vld [vmem:[%s2547_s3 + $0x18] sm:$0xff] }
  0x89   :  { %1544 = vmatprep.subr.bf16.mxu1 %v1543_v33  ;;  %608 = vmatprep.subr.mxu0 %v528_v29  ;;  %v827_v29 = vld [vmem:[%s2548_s4 + $0x30] sm:$0xff] }
  0x8a   :  { %609 = vmatpush1.msra.mxu0 %v527_v30  ;;  %v828_v30 = vld [vmem:[%s2548_s4 + $0x38] sm:$0xff] }
 0x154   :  { %v207_v36 = vpop.f32.mrb[0].mxu0 }
 0x155   :  { %v209_v37 = vpop.f32.mrb[1].mxu0  ;;  %v218_v42 = vmax.f32 %v207_v36, 0.0  ;;  %v1545_v36 = vpack.c.bf16 %v333_v35, %v332_v34 }
 0x156   :  { %v219_v43 = vmax.f32 %v209_v37, 0.0 }
 0x157   :  { %1546 = vmatpush3.bf16.msra.mxu1 %v1545_v36 }
 0x158   :  { %v213_v38 = vpop.f32.mrb[2].mxu0 }
 0x159   :  { %v220_v39 = vmax.f32 %v213_v38, 0.0  ;;  %v215_v40 = vpop.f32.mrb[3].mxu0 }
 0x15a   :  { %v221_v41 = vmax.f32 %v215_v40, 0.0  ;;  %v1740_v40 = vmov 0.0|0.0  }
 0x15b   :  { %230 = vrot.lane.b32.xlu0 %v220_v39, %s1738_s0  ;;  %1547 = vmatprep.subr.bf16.mxu1 %v1740_v40 }
 0x15c   :  { %232 = vrot.lane.b32.xlu1 %v221_v41, %s1738_s0 }
 0x15f   :  { %226 = vrot.lane.b32.xlu0 %v218_v42, %s1738_s0 }
 0x160   :  { %228 = vrot.lane.b32.xlu1 %v219_v43, %s1738_s0 }
 0x1cd   :  { %v231_v44 = vpop.permute.xlu0 %230 }
 0x1ce   :  { %v233_v45 = vpop.permute.xlu1 %232 }
 0x1cf   :  { %v236_v46 = vsel %vm234_vm7, %v231_v44, %v233_v45 }
 0x1d0   :  { %v1963_v47 = vmax.f32 %v220_v39, %v236_v46 }
 0x1d1   :  { %v227_v48 = vpop.permute.xlu0 %226 }
 0x1d2   :  { %245 = vrot.lane.b32.xlu0 %v1963_v47, %s1739_s12  ;;  %v229_v49 = vpop.permute.xlu1 %228 }
 0x1d3   :  { %v235_v50 = vsel %vm234_vm7, %v227_v48, %v229_v49 }
 0x1d4   :  { %v1966_v51 = vmax.f32 %v218_v42, %v235_v50 }
 0x1d6   :  { %243 = vrot.lane.b32.xlu1 %v1966_v51, %s1739_s12 }
 0x244   :  { %v246_v32 = vpop.permute.xlu0 %245 }
 0x245   :  { %v250_v37 = vmax.f32 %v1963_v47, %v246_v32  ;;  %v525_v32 = vld [vmem:[%s2547_s3] sm:$0xff] }
 0x247   :  { %v280_v42 = vrot.slane %v250_v37, 2  ;;  %v276_v44 = vrot.slane %v250_v37, 1  ;;  %v284_v49 = vrot.slane %v250_v37, 3  ;;  %v288_v50 = vrot.slane %v250_v37, 4 }
 0x248   :  { %v244_v38 = vpop.permute.xlu1 %243 }
 0x249   :  { %v249_v39 = vmax.f32 %v1966_v51, %v244_v38  ;;  %v1745_v51 = vmov 0.0   ;;  %v532_v38 = vld [vmem:[%s2547_s3 + $0x38] sm:$0xff] }
 0x24a   :  { %672 = vmatprep.mubr.f32.mxu0 %v1745_v51  ;;  %750 = vmatprep.subr.mxu0 %v532_v38  ;;  %v878_v38 = vld [vmem:[%s2548_s4 + $0x1c8] sm:$0xff] }
 0x24b   :  { %v256_v41 = vrot.slane %v249_v39, 2  ;;  %v252_v43 = vrot.slane %v249_v39, 1  ;;  %v260_v48 = vrot.slane %v249_v39, 3  ;;  %v264_v47 = vrot.slane %v249_v39, 4 }
 0x24d   :  { %v1706_v45 = vpack.i.bf16 %v256_v41, %v280_v42  ;;  %v1701_v46 = vpack.i.bf16 %v252_v43, %v276_v44 }
 0x24f   :  { %1707 = vrot.lane.b32.xlu1 %v1706_v45, %s1741_s24  ;;  %1702 = vrot.lane.b32.xlu0 %v1701_v46, %s1742_s25 }
 0x253   :  { %261 = vrot.lane.b32.xlu1 %v260_v48, %s1743_s26  ;;  %285 = vrot.lane.b32.xlu0 %v284_v49, %s1743_s26  ;;  %v837_v49 = vld [vmem:[%s2548_s4 + $0x80] sm:$0xff] }
 0x257   :  { %265 = vrot.lane.b32.xlu1 %v264_v47, %s1744_s27  ;;  %289 = vrot.lane.b32.xlu0 %v288_v50, %s1744_s27  ;;  %v529_v50 = vld [vmem:[%s2547_s3 + $0x20] sm:$0xff] }
 0x2c1   :  { %v1708_v52 = vpop.permute.xlu1 %1707  ;;  %v1703_v53 = vpop.permute.xlu0 %1702 }
 0x2c2   :  { %v1710_v54 = vunpack.i.h.bf16 %v1708_v52  ;;  %v1709_v55 = vunpack.i.l.bf16 %v1708_v52  ;;  %v1705_v56 = vunpack.i.h.bf16 %v1703_v53  ;;  %v1704_v57 = vunpack.i.l.bf16 %v1703_v53  ;;  %v838_v52 = vld [vmem:[%s2548_s4 + $0x88] sm:$0xff]  ;;  %v869_v53 = vld [vmem:[%s2548_s4 + $0x180] sm:$0xff] }
 0x2c4   :  { %v292_v58 = vsel %vm127_vm5, %v249_v39, %v1704_v57  ;;  %v293_v59 = vsel %vm127_vm5, %v250_v37, %v1704_v57  ;;  %v294_v60 = vsel %vm269_vm8, %v1704_v57, %v1709_v55  ;;  %v270_v0 = vsel %vm269_vm8, %v1705_v56, %v1710_v54  ;;  %v530_v37 = vld [vmem:[%s2547_s3 + $0x28] sm:$0xff]  ;;  %v821_v57 = vld [vmem:[%s2548_s4] sm:$0xff] }
 0x2c5   :  { %v302_v61 = vrot.slane %v292_v58, 4  ;;  %v303_v62 = vrot.slane %v293_v59, 4  ;;  %v262_v63 = vpop.permute.xlu1 %261  ;;  %v286_v1 = vpop.permute.xlu0 %285  ;;  %v268_v10 = vsel %vm127_vm5, %v249_v39, %v1705_v56  ;;  %v870_v54 = vld [vmem:[%s2548_s4 + $0x188] sm:$0xff]  ;;  %v531_v56 = vld [vmem:[%s2547_s3 + $0x30] sm:$0xff]  ;;  %v853_v59 = vld [vmem:[%s2548_s4 + $0x100] sm:$0xff] }
 0x2c6   :  { %v295_v4 = vsel %vm271_vm9, %v294_v60, %v286_v1  ;;  %v272_v7 = vsel %vm271_vm9, %v270_v0, %v262_v63  ;;  %v822_v58 = vld [vmem:[%s2548_s4 + $0x8] sm:$0xff]  ;;  %v1591_v0 = vpack.c.bf16 %v870_v54, %v869_v53  ;;  %v831_v54 = vld [vmem:[%s2548_s4 + $0x50] sm:$0xff] }
 0x2c7   :  { %v305_v5 = vrot.slane %v295_v4, 4  ;;  %v304_v6 = vsel %vm301_vm10, %v302_v61, %v303_v62  ;;  %v854_v60 = vld [vmem:[%s2548_s4 + $0x108] sm:$0xff]  ;;  %v839_v61 = vld [vmem:[%s2548_s4 + $0x90] sm:$0xff]  ;;  %v1561_v4 = vpack.c.bf16 %v822_v58, %v821_v57 }
 0x2c8   :  { %v313_v13 = vsel %vm312_vm11, %v268_v10, %v304_v6  ;;  %v823_v6 = vld [vmem:[%s2548_s4 + $0x10] sm:$0xff] }
 0x2c9   :  { %v314_v9 = vsel %vm312_vm11, %v272_v7, %v305_v5  ;;  %v290_v17 = vpop.permute.xlu0 %289  ;;  %v266_v23 = vpop.permute.xlu1 %265  ;;  %v1593_v5 = vpack.c.bf16 %v854_v60, %v853_v59  ;;  %v824_v7 = vld [vmem:[%s2548_s4 + $0x18] sm:$0xff]  ;;  %v855_v10 = vld [vmem:[%s2548_s4 + $0x110] sm:$0xff]  ;;  %v849_v60 = vld [vmem:[%s2548_s4 + $0xe0] sm:$0xff] }
 0x2ca   :  { %431 = vmatprep.mubr.f32.mxu1 %v314_v9  ;;  %v296_v21 = vsel %vm273_vm13, %v286_v1, %v290_v17  ;;  %v274_v25 = vsel %vm273_vm13, %v262_v63, %v266_v23  ;;  %v1559_v63 = vpack.c.bf16 %v838_v52, %v837_v49  ;;  %v840_v1 = vld [vmem:[%s2548_s4 + $0x98] sm:$0xff]  ;;  %v1595_v9 = vpack.c.bf16 %v872_v3, %v871_v2  ;;  %v825_v17 = vld [vmem:[%s2548_s4 + $0x20] sm:$0xff]  ;;  %v843_v23 = vld [vmem:[%s2548_s4 + $0xb0] sm:$0xff] }
 0x2cb   :  { %432 = vmatmul.mubr.f32.vlgmr.msra.gmra.mrb[0].mxu1 %v313_v13  ;;  %v307_v24 = vrot.slane %v296_v21, 4  ;;  %v873_v13 = vld [vmem:[%s2548_s4 + $0x1a0] sm:$0xff]  ;;  %v1565_v15 = vpack.c.bf16 %v824_v7, %v823_v6  ;;  %v1597_v16 = vpack.c.bf16 %v856_v11, %v855_v10  ;;  %v848_v49 = vld [vmem:[%s2548_s4 + $0xd8] sm:$0xff]  ;;  %v863_v58 = vld [vmem:[%s2548_s4 + $0x150] sm:$0xff] }
 0x2cc   :  { %1549 = vmatpush3.bf16.msra.mxu1 %v1548_v8  ;;  %1464 = vmatprep.mubr.msk.f32.mxu1 %vm1746_vm12, %v1745_v51  ;;  %v1563_v8 = vpack.c.bf16 %v840_v1, %v839_v61  ;;  %v857_v21 = vld [vmem:[%s2548_s4 + $0x120] sm:$0xff]  ;;  %v864_v59 = vld [vmem:[%s2548_s4 + $0x158] sm:$0xff]  ;;  %v850_v61 = vld [vmem:[%s2548_s4 + $0xe8] sm:$0xff] }
 0x2cd   :  { %1550 = vmatprep.subr.bf16.mxu1 %v1740_v40  ;;  %v315_v26 = vsel %vm312_vm11, %v274_v25, %v307_v24  ;;  %v844_v24 = vld [vmem:[%s2548_s4 + $0xb8] sm:$0xff]  ;;  %v875_v25 = vld [vmem:[%s2548_s4 + $0x1b0] sm:$0xff]  ;;  %v1613_v1 = vpack.c.bf16 %v864_v59, %v863_v58  ;;  %v833_v2 = vld [vmem:[%s2548_s4 + $0x60] sm:$0xff] }
 0x2ce   :  { %v317_v28 = vsel %vm316_vm14, %v315_v26, 1.0  ;;  %v876_v26 = vld [vmem:[%s2548_s4 + $0x1b8] sm:$0xff]  ;;  %v834_v3 = vld [vmem:[%s2548_s4 + $0x68] sm:$0xff]  ;;  %v865_v6 = vld [vmem:[%s2548_s4 + $0x160] sm:$0xff] }
 0x2cf   :  { %v866_v7 = vld [vmem:[%s2548_s4 + $0x168] sm:$0xff]  ;;  %v883_v10 = vld [vmem:[%s2548_s4 + $0x1f0] sm:$0xff]  ;;  %v884_v11 = vld [vmem:[%s2548_s4 + $0x1f8] sm:$0xff] }
 0x2d0   :  { %1552 = vmatpush3.bf16.msra.mxu1 %v1551_v14  ;;  %v874_v14 = vld [vmem:[%s2548_s4 + $0x1a8] sm:$0xff] }
 0x2d1   :  { %1553 = vmatprep.subr.bf16.mxu1 %v1740_v40  ;;  %v1599_v20 = vpack.c.bf16 %v874_v14, %v873_v13  ;;  %v835_v13 = vld [vmem:[%s2548_s4 + $0x70] sm:$0xff] }
 0x2d4   :  { %1555 = vmatpush3.bf16.msra.mxu1 %v1554_v18  ;;  %v826_v18 = vld [vmem:[%s2548_s4 + $0x28] sm:$0xff] }
 0x2d5   :  { %1556 = vmatprep.subr.bf16.mxu1 %v1740_v40 }
 0x2d8   :  { %1558 = vmatpush3.bf16.msra.mxu1 %v1557_v22  ;;  %v858_v22 = vld [vmem:[%s2548_s4 + $0x128] sm:$0xff] }
 0x2d9   :  { %1462 = vmatprep.subr.mxu1 %v1745_v51 }
 0x2dc   :  { %1463 = vmatpush3.msk.msra.mxu1 %vm363_vm15, %v358_v27  ;;  %v1569_v27 = vpack.c.bf16 %v826_v18, %v825_v17  ;;  %v867_v17 = vld [vmem:[%s2548_s4 + $0x170] sm:$0xff]  ;;  %v868_v18 = vld [vmem:[%s2548_s4 + $0x178] sm:$0xff] }
 0x2dd   :  { %1465 = vmatmul.mubr.msk.f32.vlgmr.msra.gmra.mrb[2].mxu1 %vm359_vm1, %v317_v28  ;;  %537 = vmatprep.subr.mxu1 %v526_v31  ;;  %v1601_v28 = vpack.c.bf16 %v858_v22, %v857_v21  ;;  %v1571_v31 = vpack.c.bf16 %v844_v24, %v843_v23  ;;  %v901_v21 = vld [vmem:[%s2548_s4 + $0x280] sm:$0xff]  ;;  %v902_v22 = vld [vmem:[%s2548_s4 + $0x288] sm:$0xff] }
 0x2de   :  { %601 = vmatprep.mubr.f32.mxu1 %v1745_v51  ;;  %538 = vmatpush1.msra.mxu1 %v525_v32  ;;  %v1603_v32 = vpack.c.bf16 %v876_v26, %v875_v25  ;;  %v933_v23 = vld [vmem:[%s2548_s4 + $0x380] sm:$0xff]  ;;  %v1623_v24 = vpack.c.bf16 %v902_v22, %v901_v21  ;;  %v934_v25 = vld [vmem:[%s2548_s4 + $0x388] sm:$0xff] }
 0x2df   :  { %679 = vmatprep.subr.mxu1 %v530_v37  ;;  %v877_v37 = vld [vmem:[%s2548_s4 + $0x1c0] sm:$0xff]  ;;  %v1655_v26 = vpack.c.bf16 %v934_v25, %v933_v23  ;;  %v926_v22 = vld [vmem:[%s2548_s4 + $0x348] sm:$0xff]  ;;  %v911_v23 = vld [vmem:[%s2548_s4 + $0x2d0] sm:$0xff] }
 0x2e0   :  { %v925_v21 = vld [vmem:[%s2548_s4 + $0x340] sm:$0xff]  ;;  %v943_v25 = vld [vmem:[%s2548_s4 + $0x3d0] sm:$0xff] }
 0x39e   :  { %v1293_v33 = vpop.f32.mrb[0].mxu1 }
 0x39f   :  { %v1294_v34 = vpop.f32.mrb[1].mxu1 }
 0x3a0   :  { %v1295_v35 = vadd.f32 %v1294_v34, %v1293_v33  ;;  %v859_v33 = vld [vmem:[%s2548_s4 + $0x130] sm:$0xff]  ;;  %v860_v34 = vld [vmem:[%s2548_s4 + $0x138] sm:$0xff] }
 0x3b0   :  { %v503_v36 = vpop.f32.mrb[2].mxu1 }
 0x3b1   :  { %v504_v39 = vadd.f32 %v1295_v35, %v503_v36  ;;  %v1466_v40 = vpop.f32.mrb[3].mxu1  ;;  %v845_v35 = vld [vmem:[%s2548_s4 + $0xc0] sm:$0xff]  ;;  %v846_v36 = vld [vmem:[%s2548_s4 + $0xc8] sm:$0xff] }
 0x3b2   :  { %v1605_v40 = vpack.c.bf16 %v860_v34, %v859_v33  ;;  %v935_v33 = vld [vmem:[%s2548_s4 + $0x390] sm:$0xff]  ;;  %v936_v34 = vld [vmem:[%s2548_s4 + $0x398] sm:$0xff] }
 0x3b3   :  { %v507_v41 = vmax.f32 %v504_v39, 0.0  ;;  %v1573_v39 = vpack.c.bf16 %v828_v30, %v827_v29  ;;  %v917_v29 = vld [vmem:[%s2548_s4 + $0x300] sm:$0xff]  ;;  %v918_v30 = vld [vmem:[%s2548_s4 + $0x308] sm:$0xff] }
 0x3b5   :  { %v509_v42 = vrot.slane %v507_v41, 2  ;;  %v512_v43 = vrot.slane %v507_v41, 1  ;;  %v514_v44 = vrot.slane %v507_v41, 3 }
 0x3b7   :  { %v511_v45 = vsel %vm134_vm0, %v507_v41, %v509_v42  ;;  %v516_v46 = vsel %vm134_vm0, %v512_v43, %v514_v44  ;;  %vm533_vm0 = vcmask 64512   ;;  %v829_v41 = vld [vmem:[%s2548_s4 + $0x40] sm:$0xff]  ;;  %v830_v42 = vld [vmem:[%s2548_s4 + $0x48] sm:$0xff]  ;;  %v1575_v43 = vpack.c.bf16 %v846_v36, %v845_v35 }
 0x3b8   :  { %v517_v48 = vmax.f32 %v511_v45, %v516_v46  ;;  %v1607_v44 = vpack.c.bf16 %v878_v38, %v877_v37  ;;  %v861_v45 = vld [vmem:[%s2548_s4 + $0x140] sm:$0xff]  ;;  %v862_v46 = vld [vmem:[%s2548_s4 + $0x148] sm:$0xff]  ;;  %v1577_v52 = vpack.c.bf16 %v830_v42, %v829_v41  ;;  %v1657_v38 = vpack.c.bf16 %v918_v30, %v917_v29  ;;  %v895_v29 = vld [vmem:[%s2548_s4 + $0x250] sm:$0xff] }
 0x3b9   :  { %v1609_v53 = vpack.c.bf16 %v862_v46, %v861_v45  ;;  %v919_v45 = vld [vmem:[%s2548_s4 + $0x310] sm:$0xff]  ;;  %v920_v46 = vld [vmem:[%s2548_s4 + $0x318] sm:$0xff] }
 0x3ba   :  { %519 = vrot.lane.b32.xlu0 %v517_v48, %s1747_s29  ;;  %v896_v30 = vld [vmem:[%s2548_s4 + $0x258] sm:$0xff] }
 0x42c   :  { %v520_v47 = vpop.permute.xlu0 %519 }
 0x42d   :  { %v522_v55 = vmax.f32 %v517_v48, %v520_v47  ;;  %v847_v48 = vld [vmem:[%s2548_s4 + $0xd0] sm:$0xff] }
 0x42e   :  { %v879_v47 = vld [vmem:[%s2548_s4 + $0x1d0] sm:$0xff] }
 0x42f   :  { %v524_v62 = vsel %vm523_vm2, %v522_v55, 1.0  ;;  %v832_v55 = vld [vmem:[%s2548_s4 + $0x58] sm:$0xff] }
 0x430   :  { %1257 = vmatmul.mubr.msk.f32.vlgmr.msra.gmra.mrb[4].mxu1 %vm533_vm0, %v524_v62  ;;  %1258 = vmatmul.mubr.msk.f32.vlgmr.msra.gmra.mrb[4].mxu0 %vm533_vm0, %v524_v62 }
 0x431   :  { %680 = vmatpush1.msra.mxu1 %v529_v50  ;;  %743 = vmatprep.mubr.f32.mxu1 %v1745_v51  ;;  %v880_v50 = vld [vmem:[%s2548_s4 + $0x1d8] sm:$0xff] }
 0x432   :  { %751 = vmatpush1.msra.mxu0 %v531_v56  ;;  %814 = vmatprep.mubr.f32.mxu0 %v1745_v51  ;;  %v842_v51 = vld [vmem:[%s2548_s4 + $0xa8] sm:$0xff]  ;;  %v1579_v56 = vpack.c.bf16 %v848_v49, %v847_v48  ;;  %v1611_v57 = vpack.c.bf16 %v880_v50, %v879_v47  ;;  %v905_v48 = vld [vmem:[%s2548_s4 + $0x2a0] sm:$0xff] }
 0x433   :  { %1560 = vmatprep.subr.bf16.mxu1 %v1559_v63  ;;  %1592 = vmatprep.subr.bf16.mxu0 %v1591_v0  ;;  %v1567_v19 = vpack.c.bf16 %v842_v51, %v841_v12  ;;  %v882_v63 = vld [vmem:[%s2548_s4 + $0x1e8] sm:$0xff]  ;;  %v1581_v0 = vpack.c.bf16 %v832_v55, %v831_v54  ;;  %v1585_v12 = vpack.c.bf16 %v834_v3, %v833_v2  ;;  %v937_v47 = vld [vmem:[%s2548_s4 + $0x3a0] sm:$0xff]  ;;  %v939_v2 = vld [vmem:[%s2548_s4 + $0x3b0] sm:$0xff] }
 0x434   :  { %1259 = vmatmul.mubr.msk.f32.vlgmr.msra.gmra.mrb[6].mxu1 %vm533_vm0, %v524_v62  ;;  %1260 = vmatmul.mubr.msk.f32.vlgmr.msra.gmra.mrb[6].mxu0 %vm533_vm0, %v524_v62  ;;  %v881_v62 = vld [vmem:[%s2548_s4 + $0x1e0] sm:$0xff]  ;;  %v1617_v51 = vpack.c.bf16 %v866_v7, %v865_v6  ;;  %v906_v49 = vld [vmem:[%s2548_s4 + $0x2a8] sm:$0xff]  ;;  %v1661_v55 = vpack.c.bf16 %v920_v46, %v919_v45  ;;  %v940_v3 = vld [vmem:[%s2548_s4 + $0x3b8] sm:$0xff] }
 0x435   :  { %1562 = vmatpush3.bf16.msra.mxu1 %v1561_v4  ;;  %1594 = vmatpush3.bf16.msra.mxu0 %v1593_v5  ;;  %v1583_v4 = vpack.c.bf16 %v850_v61, %v849_v60  ;;  %v1615_v5 = vpack.c.bf16 %v882_v63, %v881_v62  ;;  %v938_v50 = vld [vmem:[%s2548_s4 + $0x3a8] sm:$0xff]  ;;  %v1631_v60 = vpack.c.bf16 %v906_v49, %v905_v48  ;;  %v921_v62 = vld [vmem:[%s2548_s4 + $0x320] sm:$0xff]  ;;  %v891_v6 = vld [vmem:[%s2548_s4 + $0x230] sm:$0xff] }
 0x436   :  { %1564 = vmatprep.subr.bf16.mxu1 %v1563_v8  ;;  %1596 = vmatprep.subr.bf16.mxu0 %v1595_v9  ;;  %v851_v8 = vld [vmem:[%s2548_s4 + $0xf0] sm:$0xff]  ;;  %v852_v9 = vld [vmem:[%s2548_s4 + $0xf8] sm:$0xff]  ;;  %v1663_v61 = vpack.c.bf16 %v938_v50, %v937_v47  ;;  %v922_v63 = vld [vmem:[%s2548_s4 + $0x328] sm:$0xff] }
 0x437   :  { %v1587_v14 = vpack.c.bf16 %v852_v9, %v851_v8  ;;  %v892_v7 = vld [vmem:[%s2548_s4 + $0x238] sm:$0xff]  ;;  %v1667_v9 = vpack.c.bf16 %v940_v3, %v939_v2  ;;  %v929_v45 = vld [vmem:[%s2548_s4 + $0x360] sm:$0xff]  ;;  %v930_v46 = vld [vmem:[%s2548_s4 + $0x368] sm:$0xff] }
 0x438   :  { %v915_v48 = vld [vmem:[%s2548_s4 + $0x2f0] sm:$0xff]  ;;  %v916_v49 = vld [vmem:[%s2548_s4 + $0x2f8] sm:$0xff] }
 0x439   :  { %1566 = vmatpush3.bf16.msra.mxu1 %v1565_v15  ;;  %1598 = vmatpush3.bf16.msra.mxu0 %v1597_v16  ;;  %v1619_v15 = vpack.c.bf16 %v884_v11, %v883_v10  ;;  %v836_v16 = vld [vmem:[%s2548_s4 + $0x78] sm:$0xff]  ;;  %v923_v10 = vld [vmem:[%s2548_s4 + $0x330] sm:$0xff] }
 0x43a   :  { %1568 = vmatprep.subr.bf16.mxu1 %v1567_v19  ;;  %1600 = vmatprep.subr.bf16.mxu0 %v1599_v20  ;;  %v1589_v19 = vpack.c.bf16 %v836_v16, %v835_v13  ;;  %v1621_v20 = vpack.c.bf16 %v868_v18, %v867_v17  ;;  %v924_v11 = vld [vmem:[%s2548_s4 + $0x338] sm:$0xff]  ;;  %v941_v13 = vld [vmem:[%s2548_s4 + $0x3c0] sm:$0xff]  ;;  %v894_v18 = vld [vmem:[%s2548_s4 + $0x248] sm:$0xff] }
 0x43b   :  { %v1669_v16 = vpack.c.bf16 %v924_v11, %v923_v10  ;;  %v893_v17 = vld [vmem:[%s2548_s4 + $0x240] sm:$0xff]  ;;  %v947_v47 = vld [vmem:[%s2548_s4 + $0x3f0] sm:$0xff]  ;;  %v948_v50 = vld [vmem:[%s2548_s4 + $0x3f8] sm:$0xff] }
 0x43d   :  { %1570 = vmatpush3.bf16.msra.mxu1 %v1569_v27  ;;  %1602 = vmatpush3.bf16.msra.mxu0 %v1601_v28  ;;  %v885_v27 = vld [vmem:[%s2548_s4 + $0x200] sm:$0xff]  ;;  %v886_v28 = vld [vmem:[%s2548_s4 + $0x208] sm:$0xff] }
 0x43e   :  { %1572 = vmatprep.subr.bf16.mxu1 %v1571_v31  ;;  %1604 = vmatprep.subr.bf16.mxu0 %v1603_v32  ;;  %v903_v31 = vld [vmem:[%s2548_s4 + $0x290] sm:$0xff]  ;;  %v904_v32 = vld [vmem:[%s2548_s4 + $0x298] sm:$0xff]  ;;  %v1625_v37 = vpack.c.bf16 %v886_v28, %v885_v27  ;;  %v1641_v27 = vpack.c.bf16 %v894_v18, %v893_v17  ;;  %v1673_v28 = vpack.c.bf16 %v926_v22, %v925_v21 }
 0x441   :  { %1574 = vmatpush3.bf16.msra.mxu1 %v1573_v39  ;;  %1606 = vmatpush3.bf16.msra.mxu0 %v1605_v40  ;;  %v887_v39 = vld [vmem:[%s2548_s4 + $0x210] sm:$0xff]  ;;  %v888_v40 = vld [vmem:[%s2548_s4 + $0x218] sm:$0xff] }
 0x442   :  { %1576 = vmatprep.subr.bf16.mxu1 %v1575_v43  ;;  %1608 = vmatprep.subr.bf16.mxu0 %v1607_v44  ;;  %v1627_v43 = vpack.c.bf16 %v904_v32, %v903_v31  ;;  %v1659_v44 = vpack.c.bf16 %v936_v34, %v935_v33  ;;  %v1629_v54 = vpack.c.bf16 %v888_v40, %v887_v39  ;;  %v927_v33 = vld [vmem:[%s2548_s4 + $0x350] sm:$0xff]  ;;  %v928_v34 = vld [vmem:[%s2548_s4 + $0x358] sm:$0xff] }
 0x443   :  { %v1645_v39 = vpack.c.bf16 %v896_v30, %v895_v29  ;;  %v1677_v40 = vpack.c.bf16 %v928_v34, %v927_v33 }
 0x445   :  { %1578 = vmatpush3.bf16.msra.mxu1 %v1577_v52  ;;  %1610 = vmatpush3.bf16.msra.mxu0 %v1609_v53 }
 0x446   :  { %1580 = vmatprep.subr.bf16.mxu1 %v1579_v56  ;;  %1612 = vmatprep.subr.bf16.mxu0 %v1611_v57  ;;  %v889_v56 = vld [vmem:[%s2548_s4 + $0x220] sm:$0xff]  ;;  %v890_v57 = vld [vmem:[%s2548_s4 + $0x228] sm:$0xff] }
 0x449   :  { %1582 = vmatpush3.bf16.msra.mxu1 %v1581_v0  ;;  %1614 = vmatpush3.bf16.msra.mxu0 %v1613_v1  ;;  %v907_v0 = vld [vmem:[%s2548_s4 + $0x2b0] sm:$0xff]  ;;  %v908_v1 = vld [vmem:[%s2548_s4 + $0x2b8] sm:$0xff] }
 0x44a   :  { %1584 = vmatprep.subr.bf16.mxu1 %v1583_v4  ;;  %1616 = vmatprep.subr.bf16.mxu0 %v1615_v5  ;;  %v1633_v4 = vpack.c.bf16 %v890_v57, %v889_v56  ;;  %v1665_v5 = vpack.c.bf16 %v922_v63, %v921_v62  ;;  %v1635_v8 = vpack.c.bf16 %v908_v1, %v907_v0  ;;  %v899_v56 = vld [vmem:[%s2548_s4 + $0x270] sm:$0xff] }
 0x44b   :  { %v1651_v57 = vpack.c.bf16 %v916_v49, %v915_v48 }
 0x44d   :  { %1586 = vmatpush3.bf16.msra.mxu1 %v1585_v12  ;;  %1618 = vmatpush3.bf16.msra.mxu0 %v1617_v51  ;;  %v909_v12 = vld [vmem:[%s2548_s4 + $0x2c0] sm:$0xff]  ;;  %v910_v51 = vld [vmem:[%s2548_s4 + $0x2c8] sm:$0xff] }
 0x44e   :  { %1588 = vmatprep.subr.bf16.mxu1 %v1587_v14  ;;  %1620 = vmatprep.subr.bf16.mxu0 %v1619_v15  ;;  %v942_v14 = vld [vmem:[%s2548_s4 + $0x3c8] sm:$0xff]  ;;  %v1637_v15 = vpack.c.bf16 %v892_v7, %v891_v6 }
 0x451   :  { %1590 = vmatpush3.bf16.msra.mxu1 %v1589_v19  ;;  %1622 = vmatpush3.bf16.msra.mxu0 %v1621_v20  ;;  %v1639_v19 = vpack.c.bf16 %v910_v51, %v909_v12  ;;  %v1671_v20 = vpack.c.bf16 %v942_v14, %v941_v13 }
 0x452   :  { %1624 = vmatprep.subr.bf16.mxu1 %v1623_v24  ;;  %1656 = vmatprep.subr.bf16.mxu0 %v1655_v26  ;;  %v912_v24 = vld [vmem:[%s2548_s4 + $0x2d8] sm:$0xff] }
 0x453   :  { %v944_v26 = vld [vmem:[%s2548_s4 + $0x3d8] sm:$0xff]  ;;  %v1643_v31 = vpack.c.bf16 %v912_v24, %v911_v23 }
 0x454   :  { %v1675_v32 = vpack.c.bf16 %v944_v26, %v943_v25 }
 0x503   :  { %v603_v35 = vpop.f32.mrb[4].mxu1  ;;  %v674_v36 = vpop.f32.mrb[4].mxu0 }
 0x504   :  { %v605_v41 = vpop.f32.mrb[5].mxu1  ;;  %v676_v42 = vpop.f32.mrb[5].mxu0 }
 0x505   :  { %1013 = vmatprep.mubr.f32.mxu1 %v605_v41  ;;  %1083 = vmatprep.mubr.f32.mxu0 %v676_v42  ;;  %v897_v41 = vld [vmem:[%s2548_s4 + $0x260] sm:$0xff]  ;;  %v898_v42 = vld [vmem:[%s2548_s4 + $0x268] sm:$0xff] }
 0x506   :  { %1014 = vmatmul.mubr.f32.vlgmr.msra.gmra.mrb[8].mxu1 %v603_v35  ;;  %1084 = vmatmul.mubr.f32.vlgmr.msra.gmra.mrb[8].mxu0 %v674_v36  ;;  %v913_v35 = vld [vmem:[%s2548_s4 + $0x2e0] sm:$0xff]  ;;  %v914_v36 = vld [vmem:[%s2548_s4 + $0x2e8] sm:$0xff] }
 0x507   :  { %1626 = vmatpush3.bf16.msra.mxu1 %v1625_v37  ;;  %1658 = vmatpush3.bf16.msra.mxu0 %v1657_v38  ;;  %v2394_v52 = vpop.f32.mrb[6].mxu1  ;;  %v2396_v53 = vpop.f32.mrb[6].mxu0  ;;  %v945_v37 = vld [vmem:[%s2548_s4 + $0x3e0] sm:$0xff]  ;;  %v946_v38 = vld [vmem:[%s2548_s4 + $0x3e8] sm:$0xff] }
 0x508   :  { %v747_v58 = vpop.f32.mrb[7].mxu1  ;;  %v818_v59 = vpop.f32.mrb[7].mxu0  ;;  %1628 = vmatprep.subr.bf16.mxu1 %v1627_v43  ;;  %1660 = vmatprep.subr.bf16.mxu0 %v1659_v44  ;;  %v1647_v43 = vpack.c.bf16 %v914_v36, %v913_v35  ;;  %v1679_v44 = vpack.c.bf16 %v946_v38, %v945_v37 }
 0x509   :  { %1153 = vmatprep.mubr.f32.mxu1 %v747_v58  ;;  %1223 = vmatprep.mubr.f32.mxu0 %v818_v59  ;;  %v1683_v58 = vpack.c.bf16 %v948_v50, %v947_v47  ;;  %v900_v59 = vld [vmem:[%s2548_s4 + $0x278] sm:$0xff] }
 0x50a   :  { %v1653_v62 = vpack.c.bf16 %v900_v59, %v899_v56 }
 0x50b   :  { %1630 = vmatpush3.bf16.msra.mxu1 %v1629_v54  ;;  %1662 = vmatpush3.bf16.msra.mxu0 %v1661_v55  ;;  %v1649_v54 = vpack.c.bf16 %v898_v42, %v897_v41  ;;  %v1681_v55 = vpack.c.bf16 %v930_v46, %v929_v45 }
 0x50c   :  { %1632 = vmatprep.subr.bf16.mxu1 %v1631_v60  ;;  %1664 = vmatprep.subr.bf16.mxu0 %v1663_v61  ;;  %v931_v60 = vld [vmem:[%s2548_s4 + $0x370] sm:$0xff]  ;;  %v932_v61 = vld [vmem:[%s2548_s4 + $0x378] sm:$0xff]  ;;  %s1748_s4 = smov [#allocation2]  }
 0x50d   :  { %v1685_v63 = vpack.c.bf16 %v932_v61, %v931_v60  ;;  %s1237_s29 = sshll.u32 %s1748_s4, 4  ;;  %s1238_s29 = int_to_ptr.vmem [resolvable:$true] %s1237_s29 }
 0x50e   :  { %s1711_s30 = scalar_lea.vmem %s1238_s29, 32  ;;  %p1716_p1 = scmp.lt.s32.totalorder %s1238_s29, %s1238_s29 }
 0x50f   :  { %1634 = vmatpush3.bf16.msra.mxu1 %v1633_v4  ;;  %1666 = vmatpush3.bf16.msra.mxu0 %v1665_v5  ;;  %p1712_p0 = scmp.ne.s32.totalorder %s1238_s29, %s1711_s30  ;;  %p1717_p2 = scmp.lt.s32.totalorder %s1711_s30, %s1711_s30 }
 0x510   :  { %1636 = vmatprep.subr.bf16.mxu1 %v1635_v8  ;;  %1668 = vmatprep.subr.bf16.mxu0 %v1667_v9 }
 0x511   :  { %p1718_p3 = por %p1717_p2, %p1716_p1 }
 0x513   :  { %1638 = vmatpush3.bf16.msra.mxu1 %v1637_v15  ;;  %1670 = vmatpush3.bf16.msra.mxu0 %v1669_v16  ;;  %p1719_p4 = pnand %p1718_p3, %p1712_p0 }
 0x514   :  { %1640 = vmatprep.subr.bf16.mxu1 %v1639_v19  ;;  %1672 = vmatprep.subr.bf16.mxu0 %v1671_v20 }
 0x517   :  { %1642 = vmatpush3.bf16.msra.mxu1 %v1641_v27  ;;  %1674 = vmatpush3.bf16.msra.mxu0 %v1673_v28 }
 0x518   :  { %1644 = vmatprep.subr.bf16.mxu1 %v1643_v31  ;;  %1676 = vmatprep.subr.bf16.mxu0 %v1675_v32 }
 0x51b   :  { %1646 = vmatpush3.bf16.msra.mxu1 %v1645_v39  ;;  %1678 = vmatpush3.bf16.msra.mxu0 %v1677_v40 }
 0x51c   :  { %1648 = vmatprep.subr.bf16.mxu1 %v1647_v43  ;;  %1680 = vmatprep.subr.bf16.mxu0 %v1679_v44 }
 0x51f   :  { %1650 = vmatpush3.bf16.msra.mxu1 %v1649_v54  ;;  %1682 = vmatpush3.bf16.msra.mxu0 %v1681_v55 }
 0x520   :  { %1652 = vmatprep.subr.bf16.mxu1 %v1651_v57  ;;  %1684 = vmatprep.subr.bf16.mxu0 %v1683_v58 }
 0x523   :  { %1654 = vmatpush3.bf16.msra.mxu1 %v1653_v62  ;;  %1686 = vmatpush3.bf16.msra.mxu0 %v1685_v63 }
 0x526   :  { %1154 = vmatmul.mubr.f32.vlgmr.msra.gmra.mrb[10].mxu1 %v2394_v52  ;;  %1224 = vmatmul.mubr.f32.vlgmr.msra.gmra.mrb[10].mxu0 %v2396_v53 }
 0x5d9   :  { %v1338_v0 = vpop.f32.mrb[8].mxu1  ;;  %v1373_v1 = vpop.f32.mrb[8].mxu0 }
 0x5da   :  { %v1339_v2 = vpop.f32.mrb[9].mxu1  ;;  %v1374_v3 = vpop.f32.mrb[9].mxu0 }
 0x5db   :  { %v1340_v4 = vadd.f32 %v1339_v2, %v1338_v0  ;;  %v1375_v5 = vadd.f32 %v1374_v3, %v1373_v1 }
 0x5dd   :  { %v1086_v6 = vadd.f32 %v1375_v5, %v1340_v4 }
 0x5f9   :  { %v1408_v7 = vpop.f32.mrb[10].mxu1  ;;  %v1443_v8 = vpop.f32.mrb[10].mxu0 }
 0x5fa   :  { %v1409_v9 = vpop.f32.mrb[11].mxu1  ;;  %v1444_v10 = vpop.f32.mrb[11].mxu0 }
 0x5fb   :  { %v1410_v11 = vadd.f32 %v1409_v9, %v1408_v7  ;;  %v1445_v12 = vadd.f32 %v1444_v10, %v1443_v8 }
 0x5fd   :  { %v1156_v51 = vadd.f32 %v1410_v11, %v1086_v6 }
 0x5ff   :  { %v1226_v52 = vadd.f32 %v1445_v12, %v1156_v51 }
 0x601   :  { %1230 = vst.msk [vmem:[#allocation2] sm:$0x3] %vm1229_vm3, %v1226_v52 }
 0x602   :  { %1722 = shalt.err (!%p1719_p4)
}
 0x603   :  { %s1723_s8 = scalar_lea.hbm %s2549_s5, 32 }
 0x604   :  { %p1724_p5 = scmp.ne.s32.totalorder %s2549_s5, %s1723_s8  ;;  %p1727_p6 = scmp.lt.u32.totalorder %s1723_s8, %s2549_s5 }
 0x606   :  { %p1729_p7 = pnand %p1727_p6, %p1724_p5 }
 0x608   :  { %1732 = shalt.err (!%p1729_p7)
}
 0x609   :  { %1240 = dma.vmem_to_hbm [thread:$0]  %s1238_s29, 32, %s2549_s5, [#allocation3]  }
 0x60a   :  { %1733 = dma.done.wait [#allocation3], 32  }
 0x60b   :  { %1734 = vsyncadd [#allocation3], 4294967264 }
 0x60c   :  { %1244 = vsyncpa [#allocation3], 1 }

</bundles_post_ra>
